<compile_context>
chip_gen: v7x
topology: tpu7x:2x2x1
jax: 0.10.0
libtpu: 0.0.40
codegen_flags: <defaults>
</compile_context>

<pallas_src>
import functools
import math

import jax
import jax.numpy as jnp
from jax.experimental import pallas as pl
from jax.experimental.pallas import tpu as pltpu


# ----------------------------- helpers ---------------------------------------

def _round_up(n, m):
    return ((n + m - 1) // m) * m


def _gelu(x, approximate=False):
    if approximate:
        # tanh approximation -> EUP slot (use if VALU-bound); slight numeric delta.
        return jax.nn.gelu(x, approximate=True)
    # Exact (erf-based) GELU, matching torch.nn.GELU() default.
    return 0.5 * x * (1.0 + jax.lax.erf(x * (1.0 / math.sqrt(2.0))))


def _vmem_cap_bytes():
    """~80% of this generation's VMEM; safe 48 MiB fallback (v7x has 64 MiB)."""
    try:
        info = pltpu.get_tpu_info()
        cap = getattr(info, "vmem_capacity_bytes", None)
        if cap:
            return int(cap) * 4 // 5
    except Exception:
        pass
    return 48 * 1024 * 1024


def _pick_vmem_limit(tm, th, Dp, n_h):
    wbuf = 1 if n_h == 1 else 2          # weight chunks stream only when H-tiled
    needed = (
        2 * tm * Dp * 2                  # x tile (bf16), double-buffered
        + 2 * tm * Dp * 4                # out tile (f32), double-buffered
        + wbuf * Dp * th * 2             # W1 chunk (bf16)
        + wbuf * th * Dp * 2             # W2 chunk (bf16)
        + 2 * 8 * th * 4                 # b1 chunk (f32, sublane-padded)
        + 8 * Dp * 4                     # b2 (f32)
        + tm * Dp * 4                    # f32 accumulator scratch
        + tm * th * 4                    # (tm, th) f32 intermediate
    )
    needed = int(needed * 1.5) + (8 << 20)   # headroom for internal scratch/sems
    return max(32 << 20, min(needed, _vmem_cap_bytes()))


# --------------------------------- kernel ------------------------------------

def _ffn_kernel(x_ref, w1_ref, b1_ref, w2_ref, b2_ref, o_ref, acc_ref, *,
                approximate_gelu=False):
    # x_ref:(tm,Dp) bf16  w1_ref:(Dp,th) bf16  b1_ref:(1,th) f32
    # w2_ref:(th,Dp) bf16 b2_ref:(1,Dp) f32    o_ref:(tm,Dp) acc_ref:(tm,Dp) f32
    h_idx = pl.program_id(1)

    @pl.when(h_idx == 0)
    def _():
        acc_ref[...] = jnp.zeros_like(acc_ref)

    # bf16 MXU operands, f32 accumulation; GELU stays in f32 (exact by default).
    h = jnp.dot(x_ref[...], w1_ref[...], preferred_element_type=jnp.float32)
    h = _gelu(h + b1_ref[...], approximate=approximate_gelu)
    acc_ref[...] += jnp.dot(h.astype(jnp.bfloat16), w2_ref[...],
                            preferred_element_type=jnp.float32)

    @pl.when(h_idx == pl.num_programs(1) - 1)
    def _():
        o_ref[...] = (acc_ref[...] + b2_ref[...]).astype(o_ref.dtype)


# --------------------------------- wrapper -----------------------------------

def feed_forward(x, w1, b1, w2, b2, *, block_rows=None, hidden_tile=None,
                 approximate_gelu=False):
    """Fused Linear -> GELU -> Linear over the last axis of x."""
    orig_shape = x.shape
    D = orig_shape[-1]
    H = w1.shape[1]
    assert w1.shape == (D, H) and w2.shape == (H, D)
    assert b1.shape == (1, H) and b2.shape == (1, D)
    out_dtype = x.dtype

    x2 = x.reshape(-1, D)
    R = x2.shape[0]

    # Lane-dense feature dims (multiples of 128) -> unmasked stores, full MXU lanes.
    Dp = _round_up(D, 128)
    Hp = _round_up(H, 128)

    # Hidden-axis tile (streams W1/W2 and bounds the (tm, th) intermediate).
    if hidden_tile is None:
        th = Hp if Hp <= 2048 else 2048
    else:
        th = min(_round_up(hidden_tile, 128), Hp)
    Hp = _round_up(Hp, th)
    n_h = Hp // th

    # Row tile: single block for small R, 256-512 rows otherwise (>=~4 steps
    # on large R so both v7x TensorCores get pipelined work).
    if block_rows is None:
        Rp8 = _round_up(max(R, 8), 8)
        if Rp8 <= 512:
            tm = Rp8
        elif Rp8 <= 2048:
            tm = 256
        else:
            tm = 512
    else:
        tm = max(8, _round_up(block_rows, 8))
    Rp = _round_up(max(R, 8), tm)
    n_r = Rp // tm

    # Pad + cast ONCE in the wrapper (not per grid step).
    x2p = jnp.pad(x2, ((0, Rp - R), (0, Dp - D))).astype(jnp.bfloat16)
    w1p = jnp.pad(w1, ((0, Dp - D), (0, Hp - H))).astype(jnp.bfloat16)
    w2p = jnp.pad(w2, ((0, Hp - H), (0, Dp - D))).astype(jnp.bfloat16)
    b1p = jnp.pad(b1, ((0, 0), (0, Hp - H))).astype(jnp.float32)
    b2p = jnp.pad(b2, ((0, 0), (0, Dp - D))).astype(jnp.float32)

    vmem_limit = _pick_vmem_limit(tm, th, Dp, n_h)
    kernel = functools.partial(_ffn_kernel, approximate_gelu=approximate_gelu)

    def run(fancy):
        def spec(shape, index_map, constant):
            if fancy and constant:
                # Constant block index across the whole grid -> single buffer.
                return pl.BlockSpec(shape, index_map, pipeline_mode=pl.Buffered(1))
            return pl.BlockSpec(shape, index_map)

        cost = None
        if fancy:
            cost = pl.CostEstimate(
                flops=4 * Rp * Dp * Hp,
                transcendentals=Rp * Hp,
                bytes_accessed=(Rp * Dp * 2 + Rp * Dp * 4
                                + Dp * Hp * 2 + Hp * Dp * 2 + Hp * 4 + Dp * 4),
            )

        call = pl.pallas_call(
            kernel,
            out_shape=jax.ShapeDtypeStruct((Rp, Dp), out_dtype),
            grid=(n_r, n_h),
            in_specs=[
                spec((tm, Dp), lambda i, h: (i, 0), constant=False),      # x rows
                spec((Dp, th), lambda i, h: (0, h), constant=(n_h == 1)),  # W1
                spec((1, th), lambda i, h: (0, h), constant=(n_h == 1)),   # b1
                spec((th, Dp), lambda i, h: (h, 0), constant=(n_h == 1)),  # W2
                spec((1, Dp), lambda i, h: (0, 0), constant=True),         # b2
            ],
            out_specs=pl.BlockSpec((tm, Dp), lambda i, h: (i, 0)),
            scratch_shapes=[pltpu.VMEM((tm, Dp), jnp.float32)],
            compiler_params=pltpu.CompilerParams(
                dimension_semantics=("parallel", "arbitrary"),
                vmem_limit_bytes=vmem_limit,
            ),
            cost_estimate=cost,
        )
        return call(x2p, w1p, b1p, w2p, b2p)

    try:
        out = run(True)
    except Exception:
        # Fallback without pipeline_mode / cost_estimate (known-good config).
        out = run(False)

    if Rp != R or Dp != D:
        out = out[:R, :D]
    return out.reshape(orig_shape)
    # TODO(synk): nn.Dropout with p>0 in training mode (stochastic masking via
    # pltpu.prng_*) is not implemented; at p=0.0 / eval it is the identity.


# --------------------------- deterministic parameters -------------------------

def init_params(key, dim, hidden_dim):
    # PyTorch nn.Linear init: U(-1/sqrt(fan_in), 1/sqrt(fan_in)) for W and b.
    # Weights stored pre-transposed (in, out) so kernels compute x @ W + b.
    def linear(k, fan_in, fan_out):
        bound = 1.0 / math.sqrt(fan_in)
        kw, kb = jax.random.split(k)
        w = jax.random.uniform(kw, (fan_in, fan_out), jnp.float32, -bound, bound)
        b = jax.random.uniform(kb, (1, fan_out), jnp.float32, -bound, bound)
        return w, b

    k1, k2 = jax.random.split(key)
    w1, b1 = linear(k1, dim, hidden_dim)
    w2, b2 = linear(k2, hidden_dim, dim)
    return w1, b1, w2, b2


def _reference_f32(x, w1, b1, w2, b2):
    h = jnp.dot(x, w1) + b1[0]
    h = 0.5 * h * (1.0 + jax.lax.erf(h / math.sqrt(2.0)))
    return jnp.dot(h, w2) + b2[0]


def _reference_bf16(x, w1, b1, w2, b2):
    # Same bf16-operand / f32-accumulate numerics as the kernel.
    h = jnp.dot(x.astype(jnp.bfloat16), w1.astype(jnp.bfloat16),
                preferred_element_type=jnp.float32) + b1[0]
    h = 0.5 * h * (1.0 + jax.lax.erf(h / math.sqrt(2.0)))
    return jnp.dot(h.astype(jnp.bfloat16), w2.astype(jnp.bfloat16),
                   preferred_element_type=jnp.float32) + b2[0]


# ------------------------------------ main ------------------------------------

if __name__ == "__main__":
    batch, seq, dim, hidden_dim = 2, 8, 128, 256   # lane-dense (multiples of 128)

    key = jax.random.PRNGKey(0)
    kx, kp = jax.random.split(key)
    x = jax.random.normal(kx, (batch, seq, dim), dtype=jnp.float32)
    w1, b1, w2, b2 = init_params(kp, dim, hidden_dim)

    out = jax.block_until_ready(feed_forward(x, w1, b1, w2, b2))

    assert out.shape == (batch, seq, dim), out.shape
    assert bool(jnp.all(jnp.isfinite(out)))

    # Tight check against a reference using the same bf16-operand math.
    ref_bf16 = _reference_bf16(x, w1, b1, w2, b2)
    assert bool(jnp.allclose(out, ref_bf16, rtol=5e-3, atol=5e-3)), (
        float(jnp.max(jnp.abs(out - ref_bf16))))
    # Looser sanity check against the exact f32 torch-equivalent reference.
    ref_f32 = _reference_f32(x, w1, b1, w2, b2)
    assert bool(jnp.allclose(out, ref_f32, rtol=7e-2, atol=7e-2)), (
        float(jnp.max(jnp.abs(out - ref_f32))))

    print("KERNEL_OK")
</pallas_src>

<mosaic_0001>
module attributes {stable_mosaic.version = 11 : i64} {
  func.func @_ffn_kernel(%arg0: i32, %arg1: i32, %arg2: memref<16x128xbf16, #tpu.memory_space<vmem>>, %arg3: memref<128x256xbf16, #tpu.memory_space<vmem>>, %arg4: memref<1x256xf32, #tpu.memory_space<vmem>>, %arg5: memref<256x128xbf16, #tpu.memory_space<vmem>>, %arg6: memref<1x128xf32, #tpu.memory_space<vmem>>, %arg7: memref<16x128xf32, #tpu.memory_space<vmem>>, %arg8: memref<16x128xf32, #tpu.memory_space<vmem>>) attributes {dimension_semantics = [#tpu.dimension_semantics<parallel>, #tpu.dimension_semantics<arbitrary>], iteration_bounds = array<i64: 1, 1>, scalar_prefetch = 0 : i64, scratch_operands = 1 : i64, tpu.core_type = #tpu.core_type<tc>, window_params = [{transform_indices = @transform_0, window_bounds = array<i64: 16, 128>}, {pipeline_mode = #tpu.pipeline_mode<synchronous>, transform_indices = @transform_1, window_bounds = array<i64: 128, 256>}, {pipeline_mode = #tpu.pipeline_mode<synchronous>, transform_indices = @transform_2, window_bounds = array<i64: 1, 256>}, {pipeline_mode = #tpu.pipeline_mode<synchronous>, transform_indices = @transform_3, window_bounds = array<i64: 256, 128>}, {pipeline_mode = #tpu.pipeline_mode<synchronous>, transform_indices = @transform_4, window_bounds = array<i64: 1, 128>}, {transform_indices = @transform_5, window_bounds = array<i64: 16, 128>}]} {
    %c0_i32 = arith.constant 0 : i32
    %0 = arith.cmpi eq, %arg1, %c0_i32 : i32
    %1 = arith.extui %0 : i1 to i32
    %c0_i32_0 = arith.constant 0 : i32
    %2 = arith.cmpi ne, %1, %c0_i32_0 : i32
    scf.if %2 {
      %cst_18 = arith.constant 0.000000e+00 : f32
      %26 = vector.broadcast %cst_18 : f32 to vector<16x128xf32>
      %c0_19 = arith.constant 0 : index
      %c0_20 = arith.constant 0 : index
      %27 = vector.load %arg8[%c0_19, %c0_20] : memref<16x128xf32, #tpu.memory_space<vmem>>, vector<16x128xf32>
      tpu.vector_store %arg8[%c0_19, %c0_20], %26 {strides = array<i32>} : memref<16x128xf32, #tpu.memory_space<vmem>>, vector<16x128xf32>,
    } else {
    }
    %c0 = arith.constant 0 : index
    %c0_1 = arith.constant 0 : index
    %3 = vector.load %arg2[%c0, %c0_1] : memref<16x128xbf16, #tpu.memory_space<vmem>>, vector<16x128xbf16>
    %c0_2 = arith.constant 0 : index
    %c0_3 = arith.constant 0 : index
    %4 = vector.load %arg3[%c0_2, %c0_3] : memref<128x256xbf16, #tpu.memory_space<vmem>>, vector<128x256xbf16>
    %cst = arith.constant dense<0.000000e+00> : vector<16x256xf32>
    %5 = tpu.matmul %3, %4, %cst {dimension_numbers = #tpu.dot_dimension_numbers<[1], [0], [0], [1], [0, 0, 1, 1], [], []>} : vector<16x128xbf16>, vector<128x256xbf16>, vector<16x256xf32> -> vector<16x256xf32>
    %c0_4 = arith.constant 0 : index
    %c0_5 = arith.constant 0 : index
    %6 = vector.load %arg4[%c0_4, %c0_5] : memref<1x256xf32, #tpu.memory_space<vmem>>, vector<1x256xf32>
    %7 = vector.broadcast %6 : vector<1x256xf32> to vector<16x256xf32>
    %8 = arith.addf %5, %7 : vector<16x256xf32>
    %cst_6 = arith.constant 5.000000e-01 : f32
    %9 = vector.broadcast %cst_6 : f32 to vector<16x256xf32>
    %10 = arith.mulf %9, %8 : vector<16x256xf32>
    %cst_7 = arith.constant 0.707106769 : f32
    %11 = vector.broadcast %cst_7 : f32 to vector<16x256xf32>
    %12 = arith.mulf %8, %11 : vector<16x256xf32>
    %13 = math.erf %12 : vector<16x256xf32>
    %cst_8 = arith.constant 1.000000e+00 : f32
    %14 = vector.broadcast %cst_8 : f32 to vector<16x256xf32>
    %15 = arith.addf %14, %13 : vector<16x256xf32>
    %16 = arith.mulf %10, %15 : vector<16x256xf32>
    %c0_9 = arith.constant 0 : index
    %c0_10 = arith.constant 0 : index
    %17 = vector.load %arg8[%c0_9, %c0_10] : memref<16x128xf32, #tpu.memory_space<vmem>>, vector<16x128xf32>
    %18 = arith.truncf %16 : vector<16x256xf32> to vector<16x256xbf16>
    %c0_11 = arith.constant 0 : index
    %c0_12 = arith.constant 0 : index
    %19 = vector.load %arg5[%c0_11, %c0_12] : memref<256x128xbf16, #tpu.memory_space<vmem>>, vector<256x128xbf16>
    %cst_13 = arith.constant dense<0.000000e+00> : vector<16x128xf32>
    %20 = tpu.matmul %18, %19, %cst_13 {dimension_numbers = #tpu.dot_dimension_numbers<[1], [0], [0], [1], [0, 0, 1, 1], [], []>} : vector<16x256xbf16>, vector<256x128xbf16>, vector<16x128xf32> -> vector<16x128xf32>
    %21 = arith.addf %17, %20 : vector<16x128xf32>
    %c0_14 = arith.constant 0 : index
    %c0_15 = arith.constant 0 : index
    %22 = vector.load %arg8[%c0_14, %c0_15] : memref<16x128xf32, #tpu.memory_space<vmem>>, vector<16x128xf32>
    tpu.vector_store %arg8[%c0_14, %c0_15], %21 {strides = array<i32>} : memref<16x128xf32, #tpu.memory_space<vmem>>, vector<16x128xf32>,
    %c0_i32_16 = arith.constant 0 : i32
    %23 = arith.cmpi eq, %arg1, %c0_i32_16 : i32
    %24 = arith.extui %23 : i1 to i32
    %c0_i32_17 = arith.constant 0 : i32
    %25 = arith.cmpi ne, %24, %c0_i32_17 : i32
    scf.if %25 {
      %c0_18 = arith.constant 0 : index
      %c0_19 = arith.constant 0 : index
      %26 = vector.load %arg8[%c0_18, %c0_19] : memref<16x128xf32, #tpu.memory_space<vmem>>, vector<16x128xf32>
      %c0_20 = arith.constant 0 : index
      %c0_21 = arith.constant 0 : index
      %27 = vector.load %arg6[%c0_20, %c0_21] : memref<1x128xf32, #tpu.memory_space<vmem>>, vector<1x128xf32>
      %28 = vector.broadcast %27 : vector<1x128xf32> to vector<16x128xf32>
      %29 = arith.addf %26, %28 : vector<16x128xf32>
      %c0_22 = arith.constant 0 : index
      %c0_23 = arith.constant 0 : index
      %30 = vector.load %arg7[%c0_22, %c0_23] : memref<16x128xf32, #tpu.memory_space<vmem>>, vector<16x128xf32>
      tpu.vector_store %arg7[%c0_22, %c0_23], %29 {strides = array<i32>} : memref<16x128xf32, #tpu.memory_space<vmem>>, vector<16x128xf32>,
    } else {
    }
    return
  }
  func.func @transform_0(%arg0: i32, %arg1: i32) -> (i32, i32) {
    %c0_i32 = arith.constant 0 : i32
    %c0_i32_0 = arith.constant 0 : i32
    return %arg0, %c0_i32 : i32, i32
  }
  func.func @transform_1(%arg0: i32, %arg1: i32) -> (i32, i32) {
    %c0_i32 = arith.constant 0 : i32
    %c0_i32_0 = arith.constant 0 : i32
    return %c0_i32, %arg1 : i32, i32
  }
  func.func @transform_2(%arg0: i32, %arg1: i32) -> (i32, i32) {
    %c0_i32 = arith.constant 0 : i32
    %c0_i32_0 = arith.constant 0 : i32
    return %c0_i32, %arg1 : i32, i32
  }
  func.func @transform_3(%arg0: i32, %arg1: i32) -> (i32, i32) {
    %c0_i32 = arith.constant 0 : i32
    %c0_i32_0 = arith.constant 0 : i32
    return %arg1, %c0_i32 : i32, i32
  }
  func.func @transform_4(%arg0: i32, %arg1: i32) -> (i32, i32) {
    %c0_i32 = arith.constant 0 : i32
    %c0_i32_0 = arith.constant 0 : i32
    %c0_i32_1 = arith.constant 0 : i32
    return %c0_i32, %c0_i32_0 : i32, i32
  }
  func.func @transform_5(%arg0: i32, %arg1: i32) -> (i32, i32) {
    %c0_i32 = arith.constant 0 : i32
    %c0_i32_0 = arith.constant 0 : i32
    return %arg0, %c0_i32 : i32, i32
  }
}

module attributes {stable_mosaic.version = 11 : i64} {
  func.func @_ffn_kernel(%arg0: i32, %arg1: i32, %arg2: memref<16x128xbf16, #tpu.memory_space<vmem>>, %arg3: memref<128x256xbf16, #tpu.memory_space<vmem>>, %arg4: memref<1x256xf32, #tpu.memory_space<vmem>>, %arg5: memref<256x128xbf16, #tpu.memory_space<vmem>>, %arg6: memref<1x128xf32, #tpu.memory_space<vmem>>, %arg7: memref<16x128xf32, #tpu.memory_space<vmem>>, %arg8: memref<16x128xf32, #tpu.memory_space<vmem>>) attributes {dimension_semantics = [#tpu.dimension_semantics<parallel>, #tpu.dimension_semantics<arbitrary>], iteration_bounds = array<i64: 1, 1>, scalar_prefetch = 0 : i64, scratch_operands = 1 : i64, tpu.core_type = #tpu.core_type<tc>, window_params = [{transform_indices = @transform_0, window_bounds = array<i64: 16, 128>}, {transform_indices = @transform_1, window_bounds = array<i64: 128, 256>}, {transform_indices = @transform_2, window_bounds = array<i64: 1, 256>}, {transform_indices = @transform_3, window_bounds = array<i64: 256, 128>}, {pipeline_mode = #tpu.pipeline_mode<synchronous>, transform_indices = @transform_4, window_bounds = array<i64: 1, 128>}, {transform_indices = @transform_5, window_bounds = array<i64: 16, 128>}]} {
    %c0_i32 = arith.constant 0 : i32
    %0 = arith.cmpi eq, %arg1, %c0_i32 : i32
    %1 = arith.extui %0 : i1 to i32
    %c0_i32_0 = arith.constant 0 : i32
    %2 = arith.cmpi ne, %1, %c0_i32_0 : i32
    scf.if %2 {
      %cst_18 = arith.constant 0.000000e+00 : f32
      %26 = vector.broadcast %cst_18 : f32 to vector<16x128xf32>
      %c0_19 = arith.constant 0 : index
      %c0_20 = arith.constant 0 : index
      %27 = vector.load %arg8[%c0_19, %c0_20] : memref<16x128xf32, #tpu.memory_space<vmem>>, vector<16x128xf32>
      tpu.vector_store %arg8[%c0_19, %c0_20], %26 {strides = array<i32>} : memref<16x128xf32, #tpu.memory_space<vmem>>, vector<16x128xf32>,
    } else {
    }
    %c0 = arith.constant 0 : index
    %c0_1 = arith.constant 0 : index
    %3 = vector.load %arg2[%c0, %c0_1] : memref<16x128xbf16, #tpu.memory_space<vmem>>, vector<16x128xbf16>
    %c0_2 = arith.constant 0 : index
    %c0_3 = arith.constant 0 : index
    %4 = vector.load %arg3[%c0_2, %c0_3] : memref<128x256xbf16, #tpu.memory_space<vmem>>, vector<128x256xbf16>
    %cst = arith.constant dense<0.000000e+00> : vector<16x256xf32>
    %5 = tpu.matmul %3, %4, %cst {dimension_numbers = #tpu.dot_dimension_numbers<[1], [0], [0], [1], [0, 0, 1, 1], [], []>} : vector<16x128xbf16>, vector<128x256xbf16>, vector<16x256xf32> -> vector<16x256xf32>
    %c0_4 = arith.constant 0 : index
    %c0_5 = arith.constant 0 : index
    %6 = vector.load %arg4[%c0_4, %c0_5] : memref<1x256xf32, #tpu.memory_space<vmem>>, vector<1x256xf32>
    %7 = vector.broadcast %6 : vector<1x256xf32> to vector<16x256xf32>
    %8 = arith.addf %5, %7 : vector<16x256xf32>
    %cst_6 = arith.constant 5.000000e-01 : f32
    %9 = vector.broadcast %cst_6 : f32 to vector<16x256xf32>
    %10 = arith.mulf %9, %8 : vector<16x256xf32>
    %cst_7 = arith.constant 0.707106769 : f32
    %11 = vector.broadcast %cst_7 : f32 to vector<16x256xf32>
    %12 = arith.mulf %8, %11 : vector<16x256xf32>
    %13 = math.erf %12 : vector<16x256xf32>
    %cst_8 = arith.constant 1.000000e+00 : f32
    %14 = vector.broadcast %cst_8 : f32 to vector<16x256xf32>
    %15 = arith.addf %14, %13 : vector<16x256xf32>
    %16 = arith.mulf %10, %15 : vector<16x256xf32>
    %c0_9 = arith.constant 0 : index
    %c0_10 = arith.constant 0 : index
    %17 = vector.load %arg8[%c0_9, %c0_10] : memref<16x128xf32, #tpu.memory_space<vmem>>, vector<16x128xf32>
    %18 = arith.truncf %16 : vector<16x256xf32> to vector<16x256xbf16>
    %c0_11 = arith.constant 0 : index
    %c0_12 = arith.constant 0 : index
    %19 = vector.load %arg5[%c0_11, %c0_12] : memref<256x128xbf16, #tpu.memory_space<vmem>>, vector<256x128xbf16>
    %cst_13 = arith.constant dense<0.000000e+00> : vector<16x128xf32>
    %20 = tpu.matmul %18, %19, %cst_13 {dimension_numbers = #tpu.dot_dimension_numbers<[1], [0], [0], [1], [0, 0, 1, 1], [], []>} : vector<16x256xbf16>, vector<256x128xbf16>, vector<16x128xf32> -> vector<16x128xf32>
    %21 = arith.addf %17, %20 : vector<16x128xf32>
    %c0_14 = arith.constant 0 : index
    %c0_15 = arith.constant 0 : index
    %22 = vector.load %arg8[%c0_14, %c0_15] : memref<16x128xf32, #tpu.memory_space<vmem>>, vector<16x128xf32>
    tpu.vector_store %arg8[%c0_14, %c0_15], %21 {strides = array<i32>} : memref<16x128xf32, #tpu.memory_space<vmem>>, vector<16x128xf32>,
    %c0_i32_16 = arith.constant 0 : i32
    %23 = arith.cmpi eq, %arg1, %c0_i32_16 : i32
    %24 = arith.extui %23 : i1 to i32
    %c0_i32_17 = arith.constant 0 : i32
    %25 = arith.cmpi ne, %24, %c0_i32_17 : i32
    scf.if %25 {
      %c0_18 = arith.constant 0 : index
      %c0_19 = arith.constant 0 : index
      %26 = vector.load %arg8[%c0_18, %c0_19] : memref<16x128xf32, #tpu.memory_space<vmem>>, vector<16x128xf32>
      %c0_20 = arith.constant 0 : index
      %c0_21 = arith.constant 0 : index
      %27 = vector.load %arg6[%c0_20, %c0_21] : memref<1x128xf32, #tpu.memory_space<vmem>>, vector<1x128xf32>
      %28 = vector.broadcast %27 : vector<1x128xf32> to vector<16x128xf32>
      %29 = arith.addf %26, %28 : vector<16x128xf32>
      %c0_22 = arith.constant 0 : index
      %c0_23 = arith.constant 0 : index
      %30 = vector.load %arg7[%c0_22, %c0_23] : memref<16x128xf32, #tpu.memory_space<vmem>>, vector<16x128xf32>
      tpu.vector_store %arg7[%c0_22, %c0_23], %29 {strides = array<i32>} : memref<16x128xf32, #tpu.memory_space<vmem>>, vector<16x128xf32>,
    } else {
    }
    return
  }
  func.func @transform_0(%arg0: i32, %arg1: i32) -> (i32, i32) {
    %c0_i32 = arith.constant 0 : i32
    %c0_i32_0 = arith.constant 0 : i32
    return %arg0, %c0_i32 : i32, i32
  }
  func.func @transform_1(%arg0: i32, %arg1: i32) -> (i32, i32) {
    %c0_i32 = arith.constant 0 : i32
    %c0_i32_0 = arith.constant 0 : i32
    return %c0_i32, %arg1 : i32, i32
  }
  func.func @transform_2(%arg0: i32, %arg1: i32) -> (i32, i32) {
    %c0_i32 = arith.constant 0 : i32
    %c0_i32_0 = arith.constant 0 : i32
    return %c0_i32, %arg1 : i32, i32
  }
  func.func @transform_3(%arg0: i32, %arg1: i32) -> (i32, i32) {
    %c0_i32 = arith.constant 0 : i32
    %c0_i32_0 = arith.constant 0 : i32
    return %arg1, %c0_i32 : i32, i32
  }
  func.func @transform_4(%arg0: i32, %arg1: i32) -> (i32, i32) {
    %c0_i32 = arith.constant 0 : i32
    %c0_i32_0 = arith.constant 0 : i32
    %c0_i32_1 = arith.constant 0 : i32
    return %c0_i32, %c0_i32_0 : i32, i32
  }
  func.func @transform_5(%arg0: i32, %arg1: i32) -> (i32, i32) {
    %c0_i32 = arith.constant 0 : i32
    %c0_i32_0 = arith.constant 0 : i32
    return %arg0, %c0_i32 : i32, i32
  }
}

</mosaic_0001>

<bundles_post_ra>
// kernel: tpu_custom_call.1
= control target key start
LH: loop header
LB: loop body
LE: loop exit
PB: predicated region body
PF: predicated region fallthrough
CT: control target
= control target key end

     0   :  { %10 = vsyncpa [#allocation4], 0  ;;  %s766_s0 = inlined_call_operand.hbm [shape: bf16[16,128], index: 0, kind: input, shape index: {}]   ;;  %s767_s1 = inlined_call_operand.hbm [shape: bf16[128,256], index: 1, kind: input, shape index: {}]   ;;  %s768_s2 = inlined_call_operand.vmem [shape: f32[1,256], index: 2, kind: input, shape index: {}]   ;;  %s769_s3 = inlined_call_operand.hbm [shape: bf16[256,128], index: 3, kind: input, shape index: {}]   ;;  %s770_s4 = inlined_call_operand.vmem [shape: f32[1,128], index: 4, kind: input, shape index: {}]   ;;  %s771_s5 = inlined_call_operand.hbm [shape: f32[16,128], index: 5, kind: output, shape index: {}]  }
   0x1   :  { %11 = vsyncpa [#allocation7], 0 }
   0x2   :  { %12 = vsyncpa [#allocation5], 0  ;;  %s667_s18 = smov [#allocation6]   ;;  %s573_s22 = scalar_lea.hbm %s767_s1, 2048 }
   0x3   :  { %s30_s19 = sshll.u32 %s667_s18, 4  ;;  %p574_p0 = scmp.ne.s32.totalorder %s767_s1, %s573_s22  ;;  %s31_s19 = int_to_ptr.vmem [resolvable:$true] %s30_s19 }
   0x4   :  { %p577_p1 = scmp.lt.u32.totalorder %s573_s22, %s767_s1 }
   0x6   :  { %p579_p2 = pnand %p577_p1, %p574_p0 }
   0x8   :  { %582 = shalt.err (!%p579_p2)
}
   0x9   :  { %s583_s27 = scalar_lea.vmem %s31_s19, 2048  ;;  %p588_p4 = scmp.lt.s32.totalorder %s31_s19, %s31_s19 }
   0xa   :  { %p584_p3 = scmp.ne.s32.totalorder %s31_s19, %s583_s27  ;;  %p589_p5 = scmp.lt.s32.totalorder %s583_s27, %s583_s27 }
   0xc   :  { %p590_p6 = por %p589_p5, %p588_p4 }
   0xe   :  { %p591_p7 = pnand %p590_p6, %p584_p3 }
  0x10   :  { %594 = shalt.err (!%p591_p7)
}
  0x11   :  { %s668_s28 = smov 128   ;;  %s669_s29 = smov 8  }
  0x12   :  { %36 = dma.hbm_to_vmem [thread:$0]  %s767_s1, 2048, %s31_s19, [#allocation7], %s668_s28, %s668_s28, %s669_s29  }
  0x13   :  { %s670_s7 = smov [#allocation3]   ;;  %s595_s11 = scalar_lea.hbm %s766_s0, 128 }
  0x14   :  { %s18_s8 = sshll.u32 %s670_s7, 4  ;;  %p596_p8 = scmp.ne.s32.totalorder %s766_s0, %s595_s11  ;;  %s19_s8 = int_to_ptr.vmem [resolvable:$true] %s18_s8 }
  0x15   :  { %p599_p9 = scmp.lt.u32.totalorder %s595_s11, %s766_s0 }
  0x17   :  { %p601_p10 = pnand %p599_p9, %p596_p8 }
  0x19   :  { %604 = shalt.err (!%p601_p10)
}
  0x1a   :  { %s605_s16 = scalar_lea.vmem %s19_s8, 128  ;;  %p610_p12 = scmp.lt.s32.totalorder %s19_s8, %s19_s8 }
  0x1b   :  { %p606_p11 = scmp.ne.s32.totalorder %s19_s8, %s605_s16  ;;  %p611_p13 = scmp.lt.s32.totalorder %s605_s16, %s605_s16 }
  0x1d   :  { %p612_p0 = por %p611_p13, %p610_p12 }
  0x1f   :  { %p613_p1 = pnand %p612_p0, %p606_p11 }
  0x21   :  { %616 = shalt.err (!%p613_p1)
}
  0x22   :  { %s671_s1 = smov 64   ;;  %s672_s17 = smov 4  }
  0x23   :  { %24 = dma.hbm_to_vmem [thread:$0]  %s766_s0, 128, %s19_s8, [#allocation4], %s671_s1, %s671_s1, %s672_s17  }
  0x24   :  { %s673_s20 = smov [#allocation8]   ;;  %s617_s24 = scalar_lea.hbm %s769_s3, 2048 }
  0x25   :  { %s44_s21 = sshll.u32 %s673_s20, 4  ;;  %p618_p2 = scmp.ne.s32.totalorder %s769_s3, %s617_s24  ;;  %s45_s21 = int_to_ptr.vmem [resolvable:$true] %s44_s21 }
  0x26   :  { %p621_p3 = scmp.lt.u32.totalorder %s617_s24, %s769_s3 }
  0x28   :  { %p623_p4 = pnand %p621_p3, %p618_p2 }
  0x2a   :  { %626 = shalt.err (!%p623_p4)
}
  0x2b   :  { %s627_s6 = scalar_lea.vmem %s45_s21, 2048  ;;  %p632_p6 = scmp.lt.s32.totalorder %s45_s21, %s45_s21 }
  0x2c   :  { %p628_p5 = scmp.ne.s32.totalorder %s45_s21, %s627_s6  ;;  %p633_p7 = scmp.lt.s32.totalorder %s627_s6, %s627_s6 }
  0x2e   :  { %p634_p8 = por %p633_p7, %p632_p6 }
  0x30   :  { %p635_p9 = pnand %p634_p8, %p628_p5 }
  0x32   :  { %638 = shalt.err (!%p635_p9)
}
  0x33   :  { %50 = dma.hbm_to_vmem [thread:$0]  %s769_s3, 2048, %s45_s21, [#allocation7], %s671_s1, %s671_s1, %s672_s17  }
  0x34   :  { %661 = dma.done.wait [#allocation4], 128  }
  0x35   :  { %662 = vsyncadd [#allocation4], 4294967168 }
  0x36   :  { %663 = dma.done.wait [#allocation7], 4096  }
  0x37   :  { %664 = vsyncadd [#allocation7], 4294963200  ;;  %v674_v0 = vmov 0   ;;  %v524_v1 = vld [vmem:[#allocation6 + $0x4] ss:$8 sps:$4 sm:$0xff]   ;;  %v548_v21 = vld [vmem:[#allocation3] sm:$0xff]   ;;  %v89_v34 = vlaneseq }
  0x38   :  { %217 = vmatprep.mubr.bf16.mxu0 %v674_v0  ;;  %v526_v2 = vld [vmem:[#allocation6] ss:$8 sps:$4 sm:$0xff]   ;;  %185 = vmatprep.subr.bf16.mxu0 %v524_v1  ;;  %v527_v3 = vld [vmem:[#allocation6 + $0x14] ss:$8 sps:$4 sm:$0xff]   ;;  %v529_v4 = vld [vmem:[#allocation6 + $0x10] ss:$8 sps:$4 sm:$0xff]  }
  0x39   :  { %186 = vmatpush1.bf16.msra.mxu0 %v526_v2  ;;  %v530_v5 = vld [vmem:[#allocation6 + $0x24] ss:$8 sps:$4 sm:$0xff]   ;;  %v532_v6 = vld [vmem:[#allocation6 + $0x20] ss:$8 sps:$4 sm:$0xff]   ;;  %v533_v7 = vld [vmem:[#allocation6 + $0x34] ss:$8 sps:$4 sm:$0xff]  }
  0x3a   :  { %187 = vmatprep.subr.bf16.mxu0 %v527_v3  ;;  %v535_v8 = vld [vmem:[#allocation6 + $0x30] ss:$8 sps:$4 sm:$0xff]   ;;  %v536_v9 = vld [vmem:[#allocation6 + $0x44] ss:$8 sps:$4 sm:$0xff]   ;;  %v538_v11 = vld [vmem:[#allocation6 + $0x40] ss:$8 sps:$4 sm:$0xff]  }
  0x3b   :  { %v549_v10 = vld [vmem:[#allocation8 + $0x40] sm:$0xff]   ;;  %v551_v13 = vld [vmem:[#allocation8 + $0x48] sm:$0xff]   ;;  %v539_v14 = vld [vmem:[#allocation6 + $0x54] ss:$8 sps:$4 sm:$0xff]   ;;  %v90_v35 = vshrl.u32 %v89_v34, 7  ;;  %s675_s10 = smov [#allocation9]  }
  0x3c   :  { %v550_v12 = vld [vmem:[#allocation8] sm:$0xff]   ;;  %493 = vmatprep.subr.bf16.mxu1 %v549_v10  ;;  %v552_v15 = vld [vmem:[#allocation8 + $0x8] sm:$0xff]   ;;  %v541_v16 = vld [vmem:[#allocation6 + $0x50] ss:$8 sps:$4 sm:$0xff]   ;;  %s446_s11 = sshll.u32 %s675_s10, 4  ;;  %s447_s11 = int_to_ptr.vmem [resolvable:$true] %s446_s11 }
  0x3d   :  { %188 = vmatpush1.bf16.msra.mxu0 %v529_v4  ;;  %494 = vmatpush3.bf16.msra.mxu1 %v550_v12  ;;  %v542_v17 = vld [vmem:[#allocation6 + $0x64] ss:$8 sps:$4 sm:$0xff]   ;;  %v544_v18 = vld [vmem:[#allocation6 + $0x60] ss:$8 sps:$4 sm:$0xff]   ;;  %v545_v19 = vld [vmem:[#allocation6 + $0x74] ss:$8 sps:$4 sm:$0xff]   ;;  %p644_p11 = scmp.lt.s32.totalorder %s447_s11, %s447_s11 }
  0x3e   :  { %189 = vmatprep.subr.bf16.mxu0 %v530_v5  ;;  %495 = vmatprep.subr.bf16.mxu1 %v551_v13  ;;  %v547_v20 = vld [vmem:[#allocation6 + $0x70] ss:$8 sps:$4 sm:$0xff]   ;;  %v557_v26 = vld [vmem:[#allocation8 + $0x60] sm:$0xff]   ;;  %v559_v28 = vld [vmem:[#allocation8 + $0x68] sm:$0xff]   ;;  %v91_v36 = vsub.s32 0, %v90_v35  ;;  %v95_v38 = vsub.s32 1, %v90_v35 }
  0x3f   :  { %v553_v22 = vld [vmem:[#allocation8 + $0x50] sm:$0xff]   ;;  %v555_v24 = vld [vmem:[#allocation8 + $0x58] sm:$0xff]   ;;  %v558_v27 = vld [vmem:[#allocation8 + $0x20] sm:$0xff]   ;;  %s639_s12 = scalar_lea.vmem %s447_s11, 256 }
  0x40   :  { %v554_v23 = vld [vmem:[#allocation8 + $0x10] sm:$0xff]   ;;  %v556_v25 = vld [vmem:[#allocation8 + $0x18] sm:$0xff]   ;;  %v560_v29 = vld [vmem:[#allocation8 + $0x28] sm:$0xff]   ;;  %p640_p10 = scmp.ne.s32.totalorder %s447_s11, %s639_s12  ;;  %p645_p12 = scmp.lt.s32.totalorder %s639_s12, %s639_s12 }
  0x41   :  { %190 = vmatpush1.bf16.msra.mxu0 %v532_v6  ;;  %496 = vmatpush3.bf16.msra.mxu1 %v552_v15  ;;  %v561_v30 = vld [vmem:[#allocation8 + $0x70] sm:$0xff]   ;;  %v563_v32 = vld [vmem:[#allocation8 + $0x78] sm:$0xff]  }
  0x42   :  { %191 = vmatprep.subr.bf16.mxu0 %v533_v7  ;;  %497 = vmatprep.subr.bf16.mxu1 %v553_v22  ;;  %v562_v31 = vld [vmem:[#allocation8 + $0x30] sm:$0xff]   ;;  %v564_v33 = vld [vmem:[#allocation8 + $0x38] sm:$0xff]   ;;  %p646_p13 = por %p645_p12, %p644_p11 }
  0x43   :  { %v87_v37 = vld [vmem:[%s768_s2] sm:$0x3] }
  0x44   :  { %v92_v39 = vrot.slane %v87_v37, %v91_v36  ;;  %v96_v40 = vrot.slane %v87_v37, %v95_v38  ;;  %p647_p0 = pnand %p646_p13, %p640_p10 }
  0x45   :  { %192 = vmatpush1.bf16.msra.mxu0 %v535_v8  ;;  %498 = vmatpush3.bf16.msra.mxu1 %v554_v23 }
  0x46   :  { %193 = vmatprep.subr.bf16.mxu0 %v536_v9  ;;  %499 = vmatprep.subr.bf16.mxu1 %v555_v24  ;;  %v492_v9 = vld [vmem:[%s770_s4] ss:$0 sm:$0xff] }
  0x49   :  { %194 = vmatpush1.bf16.msra.mxu0 %v538_v11  ;;  %500 = vmatpush3.bf16.msra.mxu1 %v556_v25 }
  0x4a   :  { %195 = vmatprep.subr.bf16.mxu0 %v539_v14  ;;  %501 = vmatprep.subr.bf16.mxu1 %v557_v26 }
  0x4d   :  { %196 = vmatpush1.bf16.msra.mxu0 %v541_v16  ;;  %502 = vmatpush3.bf16.msra.mxu1 %v558_v27 }
  0x4e   :  { %197 = vmatprep.subr.bf16.mxu0 %v542_v17  ;;  %503 = vmatprep.subr.bf16.mxu1 %v559_v28 }
  0x51   :  { %198 = vmatpush1.bf16.msra.mxu0 %v544_v18  ;;  %504 = vmatpush3.bf16.msra.mxu1 %v560_v29 }
  0x52   :  { %199 = vmatprep.subr.bf16.mxu0 %v545_v19  ;;  %505 = vmatprep.subr.bf16.mxu1 %v561_v30 }
  0x55   :  { %200 = vmatpush1.bf16.msra.mxu0 %v547_v20  ;;  %506 = vmatpush3.bf16.msra.mxu1 %v562_v31 }
  0x56   :  { %507 = vmatprep.subr.bf16.mxu1 %v563_v32 }
  0x58   :  { %218 = vmatmul.mubr.bf16.vlgmr.msra.gmra.mrb[0].mxu0 %v548_v21 }
  0x59   :  { %508 = vmatpush3.bf16.msra.mxu1 %v564_v33 }
 0x12b   :  { %v219_v41 = vpop.f32.mrb[0].mxu0 }
 0x12c   :  { %v220_v42 = vadd.f32 %v219_v41, %v92_v39  ;;  %v221_v43 = vpop.f32.mrb[1].mxu0 }
 0x12d   :  { %v222_v44 = vadd.f32 %v221_v43, %v96_v40  ;;  %v223_v45 = vpop.f32.mrb[2].mxu0 }
 0x12e   :  { %v232_v46 = vmul.f32 0.70710677, %v220_v42  ;;  %v224_v47 = vadd.f32 %v223_v45, %v92_v39  ;;  %v225_v48 = vpop.f32.mrb[3].mxu0  ;;  %v228_v59 = vmul.f32 0.5, %v220_v42 }
 0x12f   :  { %v233_v49 = vmul.f32 0.70710677, %v222_v44  ;;  %v226_v50 = vadd.f32 %v225_v48, %v96_v40  ;;  %v229_v62 = vmul.f32 0.5, %v222_v44 }
 0x130   :  { %565 = verf.f32 %v232_v46  ;;  %v234_v51 = vmul.f32 0.70710677, %v224_v47  ;;  %v230_v60 = vmul.f32 0.5, %v224_v47 }
 0x131   :  { %567 = verf.f32 %v233_v49  ;;  %v235_v52 = vmul.f32 0.70710677, %v226_v50  ;;  %v231_v63 = vmul.f32 0.5, %v226_v50 }
 0x132   :  { %569 = verf.f32 %v234_v51 }
 0x133   :  { %571 = verf.f32 %v235_v52 }
 0x13a   :  { %v566_v53 = vpop.eup %565 }
 0x13b   :  { %v568_v54 = vpop.eup %567  ;;  %v240_v55 = vadd.f32 1.0, %v566_v53 }
 0x13c   :  { %v570_v56 = vpop.eup %569  ;;  %v241_v57 = vadd.f32 1.0, %v568_v54 }
 0x13d   :  { %v572_v58 = vpop.eup %571  ;;  %v242_v61 = vadd.f32 1.0, %v570_v56  ;;  %v244_v1 = vmul.f32 %v240_v55, %v228_v59 }
 0x13e   :  { %v243_v0 = vadd.f32 1.0, %v572_v58  ;;  %v245_v3 = vmul.f32 %v241_v57, %v229_v62 }
 0x13f   :  { %v246_v2 = vmul.f32 %v242_v61, %v230_v60 }
 0x140   :  { %v247_v4 = vmul.f32 %v243_v0, %v231_v63 }
 0x141   :  { %v250_v5 = vpack.c.bf16 %v246_v2, %v244_v1 }
 0x142   :  { %v251_v6 = vpack.c.bf16 %v247_v4, %v245_v3 }
 0x144   :  { %412 = vmatprep.mubr.bf16.mxu1 %v251_v6 }
 0x145   :  { %413 = vmatmul.mubr.bf16.vlgmr.msra.gmra.mrb[0].mxu1 %v250_v5 }
 0x218   :  { %v509_v7 = vpop.f32.mrb[0].mxu1 }
 0x219   :  { %v510_v8 = vpop.f32.mrb[1].mxu1 }
 0x21a   :  { %v511_v10 = vadd.f32 %v510_v8, %v509_v7  ;;  %v512_v11 = vpop.f32.mrb[2].mxu1 }
 0x21b   :  { %v513_v12 = vpop.f32.mrb[3].mxu1 }
 0x21c   :  { %v437_v13 = vadd.f32 %v511_v10, %v492_v9  ;;  %v514_v14 = vadd.f32 %v513_v12, %v512_v11 }
 0x21e   :  { %439 = vst [vmem:[#allocation9] sm:$0xff] %v437_v13  ;;  %v438_v15 = vadd.f32 %v514_v14, %v492_v9 }
 0x220   :  { %440 = vst [vmem:[#allocation9 + $0x8] sm:$0xff] %v438_v15 }
 0x221   :  { %650 = shalt.err (!%p647_p0)
}
 0x222   :  { %s651_s14 = scalar_lea.hbm %s771_s5, 256 }
 0x223   :  { %p652_p1 = scmp.ne.s32.totalorder %s771_s5, %s651_s14  ;;  %p655_p2 = scmp.lt.u32.totalorder %s651_s14, %s771_s5 }
 0x225   :  { %p657_p3 = pnand %p655_p2, %p652_p1 }
 0x227   :  { %660 = shalt.err (!%p657_p3)
}
 0x228   :  { %452 = dma.vmem_to_hbm [thread:$0]  %s447_s11, 256, %s771_s5, [#allocation5], %s668_s28, %s668_s28, %s669_s29  }
 0x229   :  { %665 = dma.done.wait [#allocation5], 256  }
 0x22a   :  { %666 = vsyncadd [#allocation5], 4294967040 }
 0x22b   :  { %456 = vsyncpa [#allocation4], 1 }
 0x22c   :  { %457 = vsyncpa [#allocation7], 1 }
 0x22d   :  { %458 = vsyncpa [#allocation5], 1 }

// kernel: tpu_custom_call.1
= control target key start
LH: loop header
LB: loop body
LE: loop exit
PB: predicated region body
PF: predicated region fallthrough
CT: control target
= control target key end

     0   :  { %10 = vsyncpa [#allocation4], 0  ;;  %s766_s0 = inlined_call_operand.hbm [shape: bf16[16,128], index: 0, kind: input, shape index: {}]   ;;  %s767_s1 = inlined_call_operand.hbm [shape: bf16[128,256], index: 1, kind: input, shape index: {}]   ;;  %s768_s2 = inlined_call_operand.vmem [shape: f32[1,256], index: 2, kind: input, shape index: {}]   ;;  %s769_s3 = inlined_call_operand.hbm [shape: bf16[256,128], index: 3, kind: input, shape index: {}]   ;;  %s770_s4 = inlined_call_operand.vmem [shape: f32[1,128], index: 4, kind: input, shape index: {}]   ;;  %s771_s5 = inlined_call_operand.hbm [shape: f32[16,128], index: 5, kind: output, shape index: {}]  }
   0x1   :  { %11 = vsyncpa [#allocation7], 0 }
   0x2   :  { %12 = vsyncpa [#allocation5], 0  ;;  %s667_s18 = smov [#allocation6]   ;;  %s573_s22 = scalar_lea.hbm %s767_s1, 2048 }
   0x3   :  { %s30_s19 = sshll.u32 %s667_s18, 4  ;;  %p574_p0 = scmp.ne.s32.totalorder %s767_s1, %s573_s22  ;;  %s31_s19 = int_to_ptr.vmem [resolvable:$true] %s30_s19 }
   0x4   :  { %p577_p1 = scmp.lt.u32.totalorder %s573_s22, %s767_s1 }
   0x6   :  { %p579_p2 = pnand %p577_p1, %p574_p0 }
   0x8   :  { %582 = shalt.err (!%p579_p2)
}
   0x9   :  { %s583_s27 = scalar_lea.vmem %s31_s19, 2048  ;;  %p588_p4 = scmp.lt.s32.totalorder %s31_s19, %s31_s19 }
   0xa   :  { %p584_p3 = scmp.ne.s32.totalorder %s31_s19, %s583_s27  ;;  %p589_p5 = scmp.lt.s32.totalorder %s583_s27, %s583_s27 }
   0xc   :  { %p590_p6 = por %p589_p5, %p588_p4 }
   0xe   :  { %p591_p7 = pnand %p590_p6, %p584_p3 }
  0x10   :  { %594 = shalt.err (!%p591_p7)
}
  0x11   :  { %s668_s28 = smov 128   ;;  %s669_s29 = smov 8  }
  0x12   :  { %36 = dma.hbm_to_vmem [thread:$0]  %s767_s1, 2048, %s31_s19, [#allocation7], %s668_s28, %s668_s28, %s669_s29  }
  0x13   :  { %s670_s7 = smov [#allocation3]   ;;  %s595_s11 = scalar_lea.hbm %s766_s0, 128 }
  0x14   :  { %s18_s8 = sshll.u32 %s670_s7, 4  ;;  %p596_p8 = scmp.ne.s32.totalorder %s766_s0, %s595_s11  ;;  %s19_s8 = int_to_ptr.vmem [resolvable:$true] %s18_s8 }
  0x15   :  { %p599_p9 = scmp.lt.u32.totalorder %s595_s11, %s766_s0 }
  0x17   :  { %p601_p10 = pnand %p599_p9, %p596_p8 }
  0x19   :  { %604 = shalt.err (!%p601_p10)
}
  0x1a   :  { %s605_s16 = scalar_lea.vmem %s19_s8, 128  ;;  %p610_p12 = scmp.lt.s32.totalorder %s19_s8, %s19_s8 }
  0x1b   :  { %p606_p11 = scmp.ne.s32.totalorder %s19_s8, %s605_s16  ;;  %p611_p13 = scmp.lt.s32.totalorder %s605_s16, %s605_s16 }
  0x1d   :  { %p612_p0 = por %p611_p13, %p610_p12 }
  0x1f   :  { %p613_p1 = pnand %p612_p0, %p606_p11 }
  0x21   :  { %616 = shalt.err (!%p613_p1)
}
  0x22   :  { %s671_s1 = smov 64   ;;  %s672_s17 = smov 4  }
  0x23   :  { %24 = dma.hbm_to_vmem [thread:$0]  %s766_s0, 128, %s19_s8, [#allocation4], %s671_s1, %s671_s1, %s672_s17  }
  0x24   :  { %s673_s20 = smov [#allocation8]   ;;  %s617_s24 = scalar_lea.hbm %s769_s3, 2048 }
  0x25   :  { %s44_s21 = sshll.u32 %s673_s20, 4  ;;  %p618_p2 = scmp.ne.s32.totalorder %s769_s3, %s617_s24  ;;  %s45_s21 = int_to_ptr.vmem [resolvable:$true] %s44_s21 }
  0x26   :  { %p621_p3 = scmp.lt.u32.totalorder %s617_s24, %s769_s3 }
  0x28   :  { %p623_p4 = pnand %p621_p3, %p618_p2 }
  0x2a   :  { %626 = shalt.err (!%p623_p4)
}
  0x2b   :  { %s627_s6 = scalar_lea.vmem %s45_s21, 2048  ;;  %p632_p6 = scmp.lt.s32.totalorder %s45_s21, %s45_s21 }
  0x2c   :  { %p628_p5 = scmp.ne.s32.totalorder %s45_s21, %s627_s6  ;;  %p633_p7 = scmp.lt.s32.totalorder %s627_s6, %s627_s6 }
  0x2e   :  { %p634_p8 = por %p633_p7, %p632_p6 }
  0x30   :  { %p635_p9 = pnand %p634_p8, %p628_p5 }
  0x32   :  { %638 = shalt.err (!%p635_p9)
}
  0x33   :  { %50 = dma.hbm_to_vmem [thread:$0]  %s769_s3, 2048, %s45_s21, [#allocation7], %s671_s1, %s671_s1, %s672_s17  }
  0x34   :  { %661 = dma.done.wait [#allocation4], 128  }
  0x35   :  { %662 = vsyncadd [#allocation4], 4294967168 }
  0x36   :  { %663 = dma.done.wait [#allocation7], 4096  }
  0x37   :  { %664 = vsyncadd [#allocation7], 4294963200  ;;  %v674_v0 = vmov 0   ;;  %v524_v1 = vld [vmem:[#allocation6 + $0x4] ss:$8 sps:$4 sm:$0xff]   ;;  %v548_v21 = vld [vmem:[#allocation3] sm:$0xff]   ;;  %v89_v34 = vlaneseq }
  0x38   :  { %217 = vmatprep.mubr.bf16.mxu0 %v674_v0  ;;  %v526_v2 = vld [vmem:[#allocation6] ss:$8 sps:$4 sm:$0xff]   ;;  %185 = vmatprep.subr.bf16.mxu0 %v524_v1  ;;  %v527_v3 = vld [vmem:[#allocation6 + $0x14] ss:$8 sps:$4 sm:$0xff]   ;;  %v529_v4 = vld [vmem:[#allocation6 + $0x10] ss:$8 sps:$4 sm:$0xff]  }
  0x39   :  { %186 = vmatpush1.bf16.msra.mxu0 %v526_v2  ;;  %v530_v5 = vld [vmem:[#allocation6 + $0x24] ss:$8 sps:$4 sm:$0xff]   ;;  %v532_v6 = vld [vmem:[#allocation6 + $0x20] ss:$8 sps:$4 sm:$0xff]   ;;  %v533_v7 = vld [vmem:[#allocation6 + $0x34] ss:$8 sps:$4 sm:$0xff]  }
  0x3a   :  { %187 = vmatprep.subr.bf16.mxu0 %v527_v3  ;;  %v535_v8 = vld [vmem:[#allocation6 + $0x30] ss:$8 sps:$4 sm:$0xff]   ;;  %v536_v9 = vld [vmem:[#allocation6 + $0x44] ss:$8 sps:$4 sm:$0xff]   ;;  %v538_v11 = vld [vmem:[#allocation6 + $0x40] ss:$8 sps:$4 sm:$0xff]  }
  0x3b   :  { %v549_v10 = vld [vmem:[#allocation8 + $0x40] sm:$0xff]   ;;  %v551_v13 = vld [vmem:[#allocation8 + $0x48] sm:$0xff]   ;;  %v539_v14 = vld [vmem:[#allocation6 + $0x54] ss:$8 sps:$4 sm:$0xff]   ;;  %v90_v35 = vshrl.u32 %v89_v34, 7  ;;  %s675_s10 = smov [#allocation9]  }
  0x3c   :  { %v550_v12 = vld [vmem:[#allocation8] sm:$0xff]   ;;  %493 = vmatprep.subr.bf16.mxu1 %v549_v10  ;;  %v552_v15 = vld [vmem:[#allocation8 + $0x8] sm:$0xff]   ;;  %v541_v16 = vld [vmem:[#allocation6 + $0x50] ss:$8 sps:$4 sm:$0xff]   ;;  %s446_s11 = sshll.u32 %s675_s10, 4  ;;  %s447_s11 = int_to_ptr.vmem [resolvable:$true] %s446_s11 }
  0x3d   :  { %188 = vmatpush1.bf16.msra.mxu0 %v529_v4  ;;  %494 = vmatpush3.bf16.msra.mxu1 %v550_v12  ;;  %v542_v17 = vld [vmem:[#allocation6 + $0x64] ss:$8 sps:$4 sm:$0xff]   ;;  %v544_v18 = vld [vmem:[#allocation6 + $0x60] ss:$8 sps:$4 sm:$0xff]   ;;  %v545_v19 = vld [vmem:[#allocation6 + $0x74] ss:$8 sps:$4 sm:$0xff]   ;;  %p644_p11 = scmp.lt.s32.totalorder %s447_s11, %s447_s11 }
  0x3e   :  { %189 = vmatprep.subr.bf16.mxu0 %v530_v5  ;;  %495 = vmatprep.subr.bf16.mxu1 %v551_v13  ;;  %v547_v20 = vld [vmem:[#allocation6 + $0x70] ss:$8 sps:$4 sm:$0xff]   ;;  %v557_v26 = vld [vmem:[#allocation8 + $0x60] sm:$0xff]   ;;  %v559_v28 = vld [vmem:[#allocation8 + $0x68] sm:$0xff]   ;;  %v91_v36 = vsub.s32 0, %v90_v35  ;;  %v95_v38 = vsub.s32 1, %v90_v35 }
  0x3f   :  { %v553_v22 = vld [vmem:[#allocation8 + $0x50] sm:$0xff]   ;;  %v555_v24 = vld [vmem:[#allocation8 + $0x58] sm:$0xff]   ;;  %v558_v27 = vld [vmem:[#allocation8 + $0x20] sm:$0xff]   ;;  %s639_s12 = scalar_lea.vmem %s447_s11, 256 }
  0x40   :  { %v554_v23 = vld [vmem:[#allocation8 + $0x10] sm:$0xff]   ;;  %v556_v25 = vld [vmem:[#allocation8 + $0x18] sm:$0xff]   ;;  %v560_v29 = vld [vmem:[#allocation8 + $0x28] sm:$0xff]   ;;  %p640_p10 = scmp.ne.s32.totalorder %s447_s11, %s639_s12  ;;  %p645_p12 = scmp.lt.s32.totalorder %s639_s12, %s639_s12 }
  0x41   :  { %190 = vmatpush1.bf16.msra.mxu0 %v532_v6  ;;  %496 = vmatpush3.bf16.msra.mxu1 %v552_v15  ;;  %v561_v30 = vld [vmem:[#allocation8 + $0x70] sm:$0xff]   ;;  %v563_v32 = vld [vmem:[#allocation8 + $0x78] sm:$0xff]  }
  0x42   :  { %191 = vmatprep.subr.bf16.mxu0 %v533_v7  ;;  %497 = vmatprep.subr.bf16.mxu1 %v553_v22  ;;  %v562_v31 = vld [vmem:[#allocation8 + $0x30] sm:$0xff]   ;;  %v564_v33 = vld [vmem:[#allocation8 + $0x38] sm:$0xff]   ;;  %p646_p13 = por %p645_p12, %p644_p11 }
  0x43   :  { %v87_v37 = vld [vmem:[%s768_s2] sm:$0x3] }
  0x44   :  { %v92_v39 = vrot.slane %v87_v37, %v91_v36  ;;  %v96_v40 = vrot.slane %v87_v37, %v95_v38  ;;  %p647_p0 = pnand %p646_p13, %p640_p10 }
  0x45   :  { %192 = vmatpush1.bf16.msra.mxu0 %v535_v8  ;;  %498 = vmatpush3.bf16.msra.mxu1 %v554_v23 }
  0x46   :  { %193 = vmatprep.subr.bf16.mxu0 %v536_v9  ;;  %499 = vmatprep.subr.bf16.mxu1 %v555_v24  ;;  %v492_v9 = vld [vmem:[%s770_s4] ss:$0 sm:$0xff] }
  0x49   :  { %194 = vmatpush1.bf16.msra.mxu0 %v538_v11  ;;  %500 = vmatpush3.bf16.msra.mxu1 %v556_v25 }
  0x4a   :  { %195 = vmatprep.subr.bf16.mxu0 %v539_v14  ;;  %501 = vmatprep.subr.bf16.mxu1 %v557_v26 }
  0x4d   :  { %196 = vmatpush1.bf16.msra.mxu0 %v541_v16  ;;  %502 = vmatpush3.bf16.msra.mxu1 %v558_v27 }
  0x4e   :  { %197 = vmatprep.subr.bf16.mxu0 %v542_v17  ;;  %503 = vmatprep.subr.bf16.mxu1 %v559_v28 }
  0x51   :  { %198 = vmatpush1.bf16.msra.mxu0 %v544_v18  ;;  %504 = vmatpush3.bf16.msra.mxu1 %v560_v29 }
  0x52   :  { %199 = vmatprep.subr.bf16.mxu0 %v545_v19  ;;  %505 = vmatprep.subr.bf16.mxu1 %v561_v30 }
  0x55   :  { %200 = vmatpush1.bf16.msra.mxu0 %v547_v20  ;;  %506 = vmatpush3.bf16.msra.mxu1 %v562_v31 }
  0x56   :  { %507 = vmatprep.subr.bf16.mxu1 %v563_v32 }
  0x58   :  { %218 = vmatmul.mubr.bf16.vlgmr.msra.gmra.mrb[0].mxu0 %v548_v21 }
  0x59   :  { %508 = vmatpush3.bf16.msra.mxu1 %v564_v33 }
 0x12b   :  { %v219_v41 = vpop.f32.mrb[0].mxu0 }
 0x12c   :  { %v220_v42 = vadd.f32 %v219_v41, %v92_v39  ;;  %v221_v43 = vpop.f32.mrb[1].mxu0 }
 0x12d   :  { %v222_v44 = vadd.f32 %v221_v43, %v96_v40  ;;  %v223_v45 = vpop.f32.mrb[2].mxu0 }
 0x12e   :  { %v232_v46 = vmul.f32 0.70710677, %v220_v42  ;;  %v224_v47 = vadd.f32 %v223_v45, %v92_v39  ;;  %v225_v48 = vpop.f32.mrb[3].mxu0  ;;  %v228_v59 = vmul.f32 0.5, %v220_v42 }
 0x12f   :  { %v233_v49 = vmul.f32 0.70710677, %v222_v44  ;;  %v226_v50 = vadd.f32 %v225_v48, %v96_v40  ;;  %v229_v62 = vmul.f32 0.5, %v222_v44 }
 0x130   :  { %565 = verf.f32 %v232_v46  ;;  %v234_v51 = vmul.f32 0.70710677, %v224_v47  ;;  %v230_v60 = vmul.f32 0.5, %v224_v47 }
 0x131   :  { %567 = verf.f32 %v233_v49  ;;  %v235_v52 = vmul.f32 0.70710677, %v226_v50  ;;  %v231_v63 = vmul.f32 0.5, %v226_v50 }
 0x132   :  { %569 = verf.f32 %v234_v51 }
 0x133   :  { %571 = verf.f32 %v235_v52 }
 0x13a   :  { %v566_v53 = vpop.eup %565 }
 0x13b   :  { %v568_v54 = vpop.eup %567  ;;  %v240_v55 = vadd.f32 1.0, %v566_v53 }
 0x13c   :  { %v570_v56 = vpop.eup %569  ;;  %v241_v57 = vadd.f32 1.0, %v568_v54 }
 0x13d   :  { %v572_v58 = vpop.eup %571  ;;  %v242_v61 = vadd.f32 1.0, %v570_v56  ;;  %v244_v1 = vmul.f32 %v240_v55, %v228_v59 }
 0x13e   :  { %v243_v0 = vadd.f32 1.0, %v572_v58  ;;  %v245_v3 = vmul.f32 %v241_v57, %v229_v62 }
 0x13f   :  { %v246_v2 = vmul.f32 %v242_v61, %v230_v60 }
 0x140   :  { %v247_v4 = vmul.f32 %v243_v0, %v231_v63 }
 0x141   :  { %v250_v5 = vpack.c.bf16 %v246_v2, %v244_v1 }
 0x142   :  { %v251_v6 = vpack.c.bf16 %v247_v4, %v245_v3 }
 0x144   :  { %412 = vmatprep.mubr.bf16.mxu1 %v251_v6 }
 0x145   :  { %413 = vmatmul.mubr.bf16.vlgmr.msra.gmra.mrb[0].mxu1 %v250_v5 }
 0x218   :  { %v509_v7 = vpop.f32.mrb[0].mxu1 }
 0x219   :  { %v510_v8 = vpop.f32.mrb[1].mxu1 }
 0x21a   :  { %v511_v10 = vadd.f32 %v510_v8, %v509_v7  ;;  %v512_v11 = vpop.f32.mrb[2].mxu1 }
 0x21b   :  { %v513_v12 = vpop.f32.mrb[3].mxu1 }
 0x21c   :  { %v437_v13 = vadd.f32 %v511_v10, %v492_v9  ;;  %v514_v14 = vadd.f32 %v513_v12, %v512_v11 }
 0x21e   :  { %439 = vst [vmem:[#allocation9] sm:$0xff] %v437_v13  ;;  %v438_v15 = vadd.f32 %v514_v14, %v492_v9 }
 0x220   :  { %440 = vst [vmem:[#allocation9 + $0x8] sm:$0xff] %v438_v15 }
 0x221   :  { %650 = shalt.err (!%p647_p0)
}
 0x222   :  { %s651_s14 = scalar_lea.hbm %s771_s5, 256 }
 0x223   :  { %p652_p1 = scmp.ne.s32.totalorder %s771_s5, %s651_s14  ;;  %p655_p2 = scmp.lt.u32.totalorder %s651_s14, %s771_s5 }
 0x225   :  { %p657_p3 = pnand %p655_p2, %p652_p1 }
 0x227   :  { %660 = shalt.err (!%p657_p3)
}
 0x228   :  { %452 = dma.vmem_to_hbm [thread:$0]  %s447_s11, 256, %s771_s5, [#allocation5], %s668_s28, %s668_s28, %s669_s29  }
 0x229   :  { %665 = dma.done.wait [#allocation5], 256  }
 0x22a   :  { %666 = vsyncadd [#allocation5], 4294967040 }
 0x22b   :  { %456 = vsyncpa [#allocation4], 1 }
 0x22c   :  { %457 = vsyncpa [#allocation7], 1 }
 0x22d   :  { %458 = vsyncpa [#allocation5], 1 }

</bundles_post_ra>
